<compile_context>
chip_gen: v5e
topology: v5e:2x2
jax: 0.10.0
libtpu: 0.0.40
codegen_flags: <defaults>
</compile_context>

<pallas_src>
import functools

import jax
import jax.numpy as jnp
from jax.experimental import pallas as pl
from jax.experimental.pallas import tpu as pltpu


# ----------------------------- tile selection ------------------------------

_TM_TARGET = 256   # rows per tile (sublane-aligned)
_TN_TARGET = 512   # output cols per tile (lane-aligned)
_TK_TARGET = 512   # contraction cols per tile (lane-aligned)


def _pick_tile(dim, target, align):
    """Largest tile <= target that is a multiple of `align` and divides `dim`.
    Falls back to the full dimension (always legal for a BlockSpec)."""
    if dim <= target:
        return dim
    t = (target // align) * align
    while t >= align:
        if dim % t == 0:
            return t
        t -= align
    return dim


# -------------------- tiled matmul + bias (+activation) --------------------

def _matmul_bias_kernel(x_ref, w_ref, b_ref, o_ref, acc_ref, *, activation):
    k = pl.program_id(2)

    @pl.when(k == 0)
    def _():
        acc_ref[...] = jnp.zeros_like(acc_ref)

    acc_ref[...] += jnp.dot(x_ref[...], w_ref[...],
                            preferred_element_type=jnp.float32)

    @pl.when(k == pl.num_programs(2) - 1)
    def _():
        y = acc_ref[...] + b_ref[...].astype(jnp.float32)
        if activation == "relu":
            y = jnp.maximum(y, 0.0)
        elif activation == "gelu":
            y = jax.nn.gelu(y)
        o_ref[...] = y.astype(o_ref.dtype)


def matmul_bias(x, w, b, activation=None):
    """y = act(x @ w + b).  x: (M, K), w: (K, N) (already PyTorch weight.T)."""
    M, K = x.shape
    Kw, N = w.shape
    assert K == Kw
    tm = _pick_tile(M, _TM_TARGET, 8)
    tn = _pick_tile(N, _TN_TARGET, 128)
    tk = _pick_tile(K, _TK_TARGET, 128)
    grid = (M // tm, N // tn, K // tk)
    return pl.pallas_call(
        functools.partial(_matmul_bias_kernel, activation=activation),
        out_shape=jax.ShapeDtypeStruct((M, N), x.dtype),
        grid_spec=pltpu.PrefetchScalarGridSpec(
            num_scalar_prefetch=0,
            grid=grid,
            in_specs=[
                pl.BlockSpec((tm, tk), lambda i, j, k: (i, k)),
                pl.BlockSpec((tk, tn), lambda i, j, k: (k, j)),
                pl.BlockSpec((1, tn), lambda i, j, k: (0, j)),
            ],
            out_specs=pl.BlockSpec((tm, tn), lambda i, j, k: (i, j)),
            scratch_shapes=[pltpu.VMEM((tm, tn), jnp.float32)],
        ),
        compiler_params=pltpu.CompilerParams(
            dimension_semantics=("parallel", "parallel", "arbitrary")),
    )(x, w, b.reshape(1, N))


# -------- tiled matmul + bias + residual add + LayerNorm (fused epilogue) ---

def _matmul_add_ln_kernel(x_ref, w_ref, b_ref, r_ref, g_ref, beta_ref,
                          o_ref, acc_ref, *, eps):
    k = pl.program_id(1)

    @pl.when(k == 0)
    def _():
        acc_ref[...] = jnp.zeros_like(acc_ref)

    acc_ref[...] += jnp.dot(x_ref[...], w_ref[...],
                            preferred_element_type=jnp.float32)

    @pl.when(k == pl.num_programs(1) - 1)
    def _():
        y = (acc_ref[...] + b_ref[...].astype(jnp.float32)
             + r_ref[...].astype(jnp.float32))
        mean = jnp.mean(y, axis=-1, keepdims=True)
        var = jnp.mean(jnp.square(y - mean), axis=-1, keepdims=True)
        y = (y - mean) * jax.lax.rsqrt(var + eps)
        y = y * g_ref[...].astype(jnp.float32) + beta_ref[...].astype(jnp.float32)
        o_ref[...] = y.astype(o_ref.dtype)


def matmul_bias_add_ln(x, w, b, residual, gamma, beta, eps=1e-5):
    """LayerNorm(residual + (x @ w + b)) over the last dim (full-N blocks)."""
    M, K = x.shape
    Kw, N = w.shape
    assert K == Kw and residual.shape == (M, N)
    tm = _pick_tile(M, _TM_TARGET, 8)
    tk = _pick_tile(K, _TK_TARGET, 128)
    grid = (M // tm, K // tk)
    return pl.pallas_call(
        functools.partial(_matmul_add_ln_kernel, eps=eps),
        out_shape=jax.ShapeDtypeStruct((M, N), x.dtype),
        grid_spec=pltpu.PrefetchScalarGridSpec(
            num_scalar_prefetch=0,
            grid=grid,
            in_specs=[
                pl.BlockSpec((tm, tk), lambda i, k: (i, k)),
                pl.BlockSpec((tk, N), lambda i, k: (k, 0)),
                pl.BlockSpec((1, N), lambda i, k: (0, 0)),
                pl.BlockSpec((tm, N), lambda i, k: (i, 0)),
                pl.BlockSpec((1, N), lambda i, k: (0, 0)),
                pl.BlockSpec((1, N), lambda i, k: (0, 0)),
            ],
            out_specs=pl.BlockSpec((tm, N), lambda i, k: (i, 0)),
            scratch_shapes=[pltpu.VMEM((tm, N), jnp.float32)],
        ),
        compiler_params=pltpu.CompilerParams(
            dimension_semantics=("parallel", "arbitrary")),
    )(x, w, b.reshape(1, N), residual, gamma.reshape(1, N), beta.reshape(1, N))


# ------------------------------- attention ---------------------------------

def _attention_kernel(qkv_ref, o_ref, *, n_q, num_heads, head_dim, e_dim, scale):
    # qkv_ref block: (1, T, 3E) for one batch element; heads are sliced from
    # the VMEM-resident block with static column slices (no HBM transposes).
    qkv = qkv_ref[0]                                        # (T, 3E)
    outs = []
    for h in range(num_heads):                              # static unroll
        q = qkv[:n_q, h * head_dim:(h + 1) * head_dim].astype(jnp.float32) * scale
        k = qkv[:, e_dim + h * head_dim:e_dim + (h + 1) * head_dim].astype(jnp.float32)
        v = qkv[:, 2 * e_dim + h * head_dim:2 * e_dim + (h + 1) * head_dim].astype(jnp.float32)
        # contract last dims of q and k: no materialized transpose.
        s = jax.lax.dot_general(q, k, (((1,), (1,)), ((), ())),
                                preferred_element_type=jnp.float32)   # (n_q, T)
        m = jnp.max(s, axis=-1, keepdims=True)
        p = jnp.exp(s - m)
        denom = jnp.sum(p, axis=-1, keepdims=True)
        p = p * pl.reciprocal(denom, approx=True)           # EUP, not VPU divide
        outs.append(jnp.dot(p, v, preferred_element_type=jnp.float32))
    # single lane-dense (n_q, E) store instead of per-head masked stores.
    o_ref[0] = jnp.concatenate(outs, axis=-1).astype(o_ref.dtype)


def attention(qkv, n_q, num_heads, scale):
    """qkv: (B, T, 3E) fused projections -> attention output (B, n_q, E)."""
    B, T, threeE = qkv.shape
    E = threeE // 3
    Dh = E // num_heads
    kernel = functools.partial(_attention_kernel, n_q=n_q, num_heads=num_heads,
                               head_dim=Dh, e_dim=E, scale=scale)
    return pl.pallas_call(
        kernel,
        out_shape=jax.ShapeDtypeStruct((B, n_q, E), qkv.dtype),
        grid=(B,),
        in_specs=[pl.BlockSpec((1, T, threeE), lambda b: (b, 0, 0))],
        out_specs=pl.BlockSpec((1, n_q, E), lambda b: (b, 0, 0)),
        compiler_params=pltpu.CompilerParams(dimension_semantics=("parallel",)),
    )(qkv)


# ----------------------------- layer forward -------------------------------

def tokengt_layer_forward(params, x, n_nodes, node_output):
    """Postnorm TokenGT encoder layer.  x: (T, B, E) (fairseq token-major)."""
    T, B, E = x.shape
    H = params["num_heads"]
    Dh = E // H
    scale = Dh ** -0.5
    Tq = n_nodes if node_output else T

    # single layout change to batch-major; everything downstream stays (B, *, E)
    xb = jnp.transpose(x, (1, 0, 2))                       # (B, T, E)
    x2d = xb.reshape(B * T, E)

    # --- fused Q/K/V projection: one (E, 3E) matmul, one pass over x ---
    qkv = matmul_bias(x2d, params["w_qkv"], params["b_qkv"])   # (B*T, 3E)
    qkv = qkv.reshape(B, T, 3 * E)

    # --- self-attention (fairseq MultiheadAttention: q scaled by Dh**-0.5) ---
    attn = attention(qkv, Tq, H, scale)                    # (B, Tq, E)
    attn2d = attn.reshape(B * Tq, E)

    # --- out-projection fused with residual add + LayerNorm1 (postnorm) ---
    residual2d = xb[:, :Tq, :].reshape(B * Tq, E)
    x1 = matmul_bias_add_ln(attn2d, params["wo"], params["bo"],
                            residual2d, params["ln1_g"], params["ln1_b"])

    # --- FFN: Linear -> ReLU (fused) -> Linear + residual + LayerNorm2 ---
    h = matmul_bias(x1, params["w1"], params["b1"],
                    activation=params["activation"])
    out2d = matmul_bias_add_ln(h, params["w2"], params["b2"],
                               x1, params["ln2_g"], params["ln2_b"])

    return out2d.reshape(B, Tq, E).transpose(1, 0, 2)      # back to (Tq, B, E)


# -------------------------- pure-JAX reference ------------------------------

def reference_forward(params, x, n_nodes, node_output):
    T, B, E = x.shape
    H = params["num_heads"]
    Dh = E // H
    scale = Dh ** -0.5

    q_in = x[:n_nodes] if node_output else x
    Tq = q_in.shape[0]

    w_qkv, b_qkv = params["w_qkv"], params["b_qkv"]
    wq, wk, wv = w_qkv[:, :E], w_qkv[:, E:2 * E], w_qkv[:, 2 * E:]
    bq, bk, bv = b_qkv[:E], b_qkv[E:2 * E], b_qkv[2 * E:]

    q = q_in.reshape(Tq * B, E) @ wq + bq
    k = x.reshape(T * B, E) @ wk + bk
    v = x.reshape(T * B, E) @ wv + bv

    qh = q.reshape(Tq, B, H, Dh).transpose(1, 2, 0, 3)
    kh = k.reshape(T, B, H, Dh).transpose(1, 2, 0, 3)
    vh = v.reshape(T, B, H, Dh).transpose(1, 2, 0, 3)

    s = jnp.einsum("bhqd,bhkd->bhqk", qh * scale, kh)
    p = jax.nn.softmax(s, axis=-1)
    oh = jnp.einsum("bhqk,bhkd->bhqd", p, vh)
    attn = oh.transpose(2, 0, 1, 3).reshape(Tq * B, E)
    attn = attn @ params["wo"] + params["bo"]

    def ln(t, g, b):
        mean = jnp.mean(t, axis=-1, keepdims=True)
        var = jnp.mean(jnp.square(t - mean), axis=-1, keepdims=True)
        return (t - mean) * jax.lax.rsqrt(var + 1e-5) * g + b

    x1 = ln(q_in.reshape(Tq * B, E) + attn, params["ln1_g"], params["ln1_b"])
    h = jnp.maximum(x1 @ params["w1"] + params["b1"], 0.0)
    h = h @ params["w2"] + params["b2"]
    out = ln(x1 + h, params["ln2_g"], params["ln2_b"])
    return out.reshape(Tq, B, E)


# --------------------------------- main -------------------------------------

def make_params(key, E, H, F):
    ks = jax.random.split(key, 8)
    n = lambda k, shape: (0.02 * jax.random.normal(k, shape)).astype(jnp.float32)
    return {
        "num_heads": H,
        "activation": "relu",
        "w_qkv": n(ks[0], (E, 3 * E)), "b_qkv": n(ks[1], (3 * E,)),
        "wo": n(ks[2], (E, E)), "bo": n(ks[3], (E,)),
        "ln1_g": jnp.ones((E,), jnp.float32), "ln1_b": jnp.zeros((E,), jnp.float32),
        "w1": n(ks[4], (E, F)), "b1": n(ks[5], (F,)),
        "w2": n(ks[6], (F, E)), "b2": n(ks[7], (E,)),
        "ln2_g": jnp.ones((E,), jnp.float32), "ln2_b": jnp.zeros((E,), jnp.float32),
    }


if __name__ == "__main__":
    T, B, E, H, F = 8, 2, 32, 4, 64       # seq=8, batch=2, hidden=32, heads=4, ffn=64
    n_nodes, node_output = 6, True

    key = jax.random.PRNGKey(0)
    pkey, xkey = jax.random.split(key)
    params = make_params(pkey, E, H, F)
    x = jax.random.normal(xkey, (T, B, E), dtype=jnp.float32)

    out = tokengt_layer_forward(params, x, n_nodes, node_output)
    out = jax.block_until_ready(out)

    ref = reference_forward(params, x, n_nodes, node_output)
    assert out.shape == (n_nodes, B, E)
    # tolerance accounts for the approximate (EUP) reciprocal in the softmax.
    assert jnp.allclose(out, ref, atol=1e-2, rtol=1e-2), "mismatch vs reference"

    print("KERNEL_OK")
</pallas_src>

<mosaic_0001>
module attributes {stable_mosaic.version = 11 : i64} {
  func.func @_matmul_bias_kernel(%arg0: i32, %arg1: i32, %arg2: i32, %arg3: memref<16x32xf32, #tpu.memory_space<vmem>>, %arg4: memref<32x96xf32, #tpu.memory_space<vmem>>, %arg5: memref<1x96xf32, #tpu.memory_space<vmem>>, %arg6: memref<16x96xf32, #tpu.memory_space<vmem>>, %arg7: memref<16x96xf32, #tpu.memory_space<vmem>>) attributes {dimension_semantics = [#tpu.dimension_semantics<parallel>, #tpu.dimension_semantics<parallel>, #tpu.dimension_semantics<arbitrary>], iteration_bounds = array<i64: 1, 1, 1>, scalar_prefetch = 0 : i64, scratch_operands = 1 : i64, tpu.core_type = #tpu.core_type<tc>, window_params = [{transform_indices = @transform_0, window_bounds = array<i64: 16, 32>}, {transform_indices = @transform_1, window_bounds = array<i64: 32, 96>}, {transform_indices = @transform_2, window_bounds = array<i64: 1, 96>}, {transform_indices = @transform_3, window_bounds = array<i64: 16, 96>}]} {
    %c0_i32 = arith.constant 0 : i32
    %0 = arith.cmpi eq, %arg2, %c0_i32 : i32
    %1 = arith.extui %0 : i1 to i32
    %c0_i32_0 = arith.constant 0 : i32
    %2 = arith.cmpi ne, %1, %c0_i32_0 : i32
    scf.if %2 {
      %cst_10 = arith.constant 0.000000e+00 : f32
      %12 = vector.broadcast %cst_10 : f32 to vector<16x96xf32>
      %c0_11 = arith.constant 0 : index
      %c0_12 = arith.constant 0 : index
      %13 = vector.load %arg7[%c0_11, %c0_12] : memref<16x96xf32, #tpu.memory_space<vmem>>, vector<16x96xf32>
      tpu.vector_store %arg7[%c0_11, %c0_12], %12 {strides = array<i32>} : memref<16x96xf32, #tpu.memory_space<vmem>>, vector<16x96xf32>,
    } else {
    }
    %c0 = arith.constant 0 : index
    %c0_1 = arith.constant 0 : index
    %3 = vector.load %arg7[%c0, %c0_1] : memref<16x96xf32, #tpu.memory_space<vmem>>, vector<16x96xf32>
    %c0_2 = arith.constant 0 : index
    %c0_3 = arith.constant 0 : index
    %4 = vector.load %arg3[%c0_2, %c0_3] : memref<16x32xf32, #tpu.memory_space<vmem>>, vector<16x32xf32>
    %c0_4 = arith.constant 0 : index
    %c0_5 = arith.constant 0 : index
    %5 = vector.load %arg4[%c0_4, %c0_5] : memref<32x96xf32, #tpu.memory_space<vmem>>, vector<32x96xf32>
    %cst = arith.constant dense<0.000000e+00> : vector<16x96xf32>
    %6 = tpu.matmul %4, %5, %cst {dimension_numbers = #tpu.dot_dimension_numbers<[1], [0], [0], [1], [0, 0, 1, 1], [], []>} : vector<16x32xf32>, vector<32x96xf32>, vector<16x96xf32> -> vector<16x96xf32>
    %7 = arith.addf %3, %6 : vector<16x96xf32>
    %c0_6 = arith.constant 0 : index
    %c0_7 = arith.constant 0 : index
    %8 = vector.load %arg7[%c0_6, %c0_7] : memref<16x96xf32, #tpu.memory_space<vmem>>, vector<16x96xf32>
    tpu.vector_store %arg7[%c0_6, %c0_7], %7 {strides = array<i32>} : memref<16x96xf32, #tpu.memory_space<vmem>>, vector<16x96xf32>,
    %c0_i32_8 = arith.constant 0 : i32
    %9 = arith.cmpi eq, %arg2, %c0_i32_8 : i32
    %10 = arith.extui %9 : i1 to i32
    %c0_i32_9 = arith.constant 0 : i32
    %11 = arith.cmpi ne, %10, %c0_i32_9 : i32
    scf.if %11 {
      %c0_10 = arith.constant 0 : index
      %c0_11 = arith.constant 0 : index
      %12 = vector.load %arg7[%c0_10, %c0_11] : memref<16x96xf32, #tpu.memory_space<vmem>>, vector<16x96xf32>
      %c0_12 = arith.constant 0 : index
      %c0_13 = arith.constant 0 : index
      %13 = vector.load %arg5[%c0_12, %c0_13] : memref<1x96xf32, #tpu.memory_space<vmem>>, vector<1x96xf32>
      %14 = vector.broadcast %13 : vector<1x96xf32> to vector<16x96xf32>
      %15 = arith.addf %12, %14 : vector<16x96xf32>
      %c0_14 = arith.constant 0 : index
      %c0_15 = arith.constant 0 : index
      %16 = vector.load %arg6[%c0_14, %c0_15] : memref<16x96xf32, #tpu.memory_space<vmem>>, vector<16x96xf32>
      tpu.vector_store %arg6[%c0_14, %c0_15], %15 {strides = array<i32>} : memref<16x96xf32, #tpu.memory_space<vmem>>, vector<16x96xf32>,
    } else {
    }
    return
  }
  func.func @transform_0(%arg0: i32, %arg1: i32, %arg2: i32) -> (i32, i32) {
    %c0_i32 = arith.constant 0 : i32
    return %arg0, %arg2 : i32, i32
  }
  func.func @transform_1(%arg0: i32, %arg1: i32, %arg2: i32) -> (i32, i32) {
    %c0_i32 = arith.constant 0 : i32
    return %arg2, %arg1 : i32, i32
  }
  func.func @transform_2(%arg0: i32, %arg1: i32, %arg2: i32) -> (i32, i32) {
    %c0_i32 = arith.constant 0 : i32
    %c0_i32_0 = arith.constant 0 : i32
    return %c0_i32, %arg1 : i32, i32
  }
  func.func @transform_3(%arg0: i32, %arg1: i32, %arg2: i32) -> (i32, i32) {
    %c0_i32 = arith.constant 0 : i32
    return %arg0, %arg1 : i32, i32
  }
}

</mosaic_0001>

<bundles_post_ra>
// kernel: tpu_custom_call.1
= control target key start
LH: loop header
LB: loop body
LE: loop exit
PB: predicated region body
PF: predicated region fallthrough
CT: control target
= control target key end

     0   :  { %8 = vsyncpa [#allocation4], 0  ;;  %s274_s0 = inlined_call_operand.hbm [shape: f32[16,32], index: 0, kind: input, shape index: {}]   ;;  %s275_s1 = inlined_call_operand.hbm [shape: f32[32,96], index: 1, kind: input, shape index: {}]   ;;  %s276_s2 = inlined_call_operand.vmem [shape: f32[1,96], index: 2, kind: input, shape index: {}]   ;;  %s277_s3 = inlined_call_operand.hbm [shape: f32[16,96], index: 3, kind: output, shape index: {}]  }
   0x1   :  { %9 = vsyncpa [#allocation7], 0 }
   0x2   :  { %10 = vsyncpa [#allocation5], 0  ;;  %s15_s14 = sshll.u32 %s274_s0, 4  ;;  %s221_s15 = smov [#allocation3]   ;;  %s16_s14 = int_to_ptr.hbm [resolvable:$true] %s15_s14 }
   0x3   :  { %s17_s16 = sshll.u32 %s221_s15, 4  ;;  %s28_s19 = sshll.u32 %s275_s1, 4  ;;  %s18_s16 = int_to_ptr.vmem [resolvable:$true] %s17_s16  ;;  %s29_s19 = int_to_ptr.hbm [resolvable:$true] %s28_s19 }
   0x4   :  { %s222_s20 = smov 128   ;;  %s223_s21 = smov 8  }
   0x5   :  { %23 = dma.hbm_to_vmem [thread:$0]  %s16_s14, 256, %s18_s16, [#allocation4], %s222_s20, %s222_s20, %s223_s21  }
   0x6   :  { %s224_s22 = smov [#allocation6]  }
   0x7   :  { %s30_s23 = sshll.u32 %s224_s22, 4  ;;  %s31_s23 = int_to_ptr.vmem [resolvable:$true] %s30_s23 }
   0x8   :  { %36 = dma.hbm_to_vmem [thread:$0]  %s29_s19, 512, %s31_s23, [#allocation7], %s222_s20, %s222_s20, %s223_s21  }
   0x9   :  { %215 = dma.done.wait [#allocation4], 256  }
   0xa   :  { %216 = vsyncadd [#allocation4], 4294967040 }
   0xb   :  { %217 = dma.done.wait [#allocation7], 512  }
   0xc   :  { %218 = vsyncadd [#allocation7], 4294966784  ;;  %vm51_vm0 = vcmask 785408   ;;  %v225_v0 = vmov 0.0   ;;  %v61_v1 = vld [vmem:[#allocation6 + $0x18] sm:$0xff]  ;;  %v60_v2 = vld [vmem:[#allocation6 + $0x10] sm:$0xff] }
   0xd   :  { %52 = vst.msk [vmem:[#allocation2] sm:$0xff] %vm51_vm0, %v225_v0  ;;  %81 = vmatpush.msra.mxu0 %v61_v1  ;;  %132 = vmatpush.msra.mxu1 %v61_v1  ;;  %v59_v3 = vld [vmem:[#allocation6 + $0x8] sm:$0xff]  ;;  %v58_v4 = vld [vmem:[#allocation6] sm:$0xff]  ;;  %v56_v5 = vld [vmem:[#allocation3] sm:$0xff]  ;;  %vm62_vm1 = vcmask 261120   ;;  %s226_s24 = smov [#allocation8]  }
   0xe   :  { %53 = vst.msk [vmem:[#allocation2 + $0x8] sm:$0xff] %vm51_vm0, %v225_v0  ;;  %v57_v6 = vld [vmem:[#allocation3 + $0x8] sm:$0xff]  ;;  %v142_v13 = vld [vmem:[%s276_s2] ss:$0 sm:$0xff]  ;;  %s114_s25 = sshll.u32 %s226_s24, 4  ;;  %s116_s28 = sshll.u32 %s277_s3, 4  ;;  %s115_s25 = int_to_ptr.vmem [resolvable:$true] %s114_s25  ;;  %s117_s28 = int_to_ptr.hbm [resolvable:$true] %s116_s28 }
   0xf   :  { %82 = vmatpush.msra.mxu0 %v60_v2  ;;  %133 = vmatpush.msra.mxu1 %v60_v2 }
  0x11   :  { %83 = vmatpush.msra.mxu0 %v59_v3  ;;  %134 = vmatpush.msra.mxu1 %v59_v3 }
  0x13   :  { %84 = vmatpush.msra.mxu0 %v58_v4  ;;  %135 = vmatpush.msra.mxu1 %v58_v4 }
  0x14   :  { %130 = vmatmul.msk.f32.vlgmr.msra.gmra.mxu0 %vm62_vm1, %v56_v5  ;;  %131 = vmatmul.msk.f32.vlgmr.msra.gmra.mxu1 %vm62_vm1, %v57_v6  ;;  %v54_v7 = vld [vmem:[#allocation2] sm:$0xff] }
  0x15   :  { %v55_v8 = vld [vmem:[#allocation2 + $0x8] sm:$0xff] }
  0x91   :  { %v86_v9 = vpop.f32.mrf.mxu0  ;;  %v89_v10 = vpop.f32.mrf.mxu1 }
  0x92   :  { %v92_v11 = vadd.f32 %v86_v9, %v54_v7  ;;  %v93_v12 = vadd.f32 %v89_v10, %v55_v8 }
  0x94   :  { %95 = vst.msk [vmem:[#allocation2] sm:$0xff] %vm51_vm0, %v92_v11 }
  0x95   :  { %96 = vst.msk [vmem:[#allocation2 + $0x8] sm:$0xff] %vm51_vm0, %v93_v12 }
  0x9b   :  { %v100_v14 = vld [vmem:[#allocation2] sm:$0xff] }
  0x9c   :  { %v101_v15 = vld [vmem:[#allocation2 + $0x8] sm:$0xff]  ;;  %v106_v16 = vadd.f32 %v142_v13, %v100_v14 }
  0x9d   :  { %v107_v17 = vadd.f32 %v142_v13, %v101_v15 }
  0x9e   :  { %108 = vst.msk [vmem:[#allocation8] sm:$0xff] %vm51_vm0, %v106_v16 }
  0x9f   :  { %109 = vst.msk [vmem:[#allocation8 + $0x8] sm:$0xff] %vm51_vm0, %v107_v17 }
  0xa0   :  { %122 = dma.vmem_to_hbm [thread:$0]  %s115_s25, 256, %s117_s28, [#allocation5], %s222_s20, %s222_s20, %s223_s21  }
  0xa1   :  { %219 = dma.done.wait [#allocation5], 256  }
  0xa2   :  { %220 = vsyncadd [#allocation5], 4294967040 }
  0xa3   :  { %127 = vsyncpa [#allocation4], 1 }
  0xa4   :  { %128 = vsyncpa [#allocation7], 1 }
  0xa5   :  { %129 = vsyncpa [#allocation5], 1 }

</bundles_post_ra>
